<compile_context>
chip_gen: v7x
topology: tpu7x:2x2x1
jax: 0.10.0
libtpu: 0.0.40
codegen_flags: <defaults>
</compile_context>

<pallas_src>
import functools

import jax
import jax.numpy as jnp
from jax.experimental import pallas as pl
from jax.experimental.pallas import tpu as pltpu


_LANE = 128
_MAX_COLS = 8192                        # widest lane-dense last dim we will use
_TARGET_BLOCK_BYTES = 2 * 1024 * 1024   # ~2 MiB per block


def _range_bound_kernel(x_ref, o_ref, *, bound_min, bound_max):
    v = x_ref[...]
    # Bounds are static (fixed at module __init__), so branch at trace time.
    if bound_min is not None:
        v = jnp.maximum(v, jnp.asarray(bound_min, v.dtype))
    if bound_max is not None:
        v = jnp.minimum(v, jnp.asarray(bound_max, v.dtype))
    o_ref[...] = v


def _sublane_multiple(dtype):
    # f32 -> 8, bf16/fp16 -> 16, int8/fp8 -> 32 (sub-32-bit packs along sublanes).
    itemsize = jnp.dtype(dtype).itemsize
    return max(8, 32 // max(itemsize, 1))


def _choose_cols(n, sub):
    """Widest power-of-two multiple of 128 that divides n, keeping >= sub rows."""
    cols = _LANE
    while (cols * 2 <= _MAX_COLS
           and n % (cols * 2) == 0
           and (n // (cols * 2)) >= sub):
        cols *= 2
    return cols


@functools.lru_cache(maxsize=None)
def _build_clip(rows, cols, block_rows, dtype_name, bound_min, bound_max):
    dtype = jnp.dtype(dtype_name)
    kernel = functools.partial(
        _range_bound_kernel, bound_min=bound_min, bound_max=bound_max)
    grid = pl.cdiv(rows, block_rows)
    # NOTE: input_output_aliases={0: 0} would let the output reuse the input
    # HBM buffer, but requires donating x at the jit boundary; left off so the
    # caller may keep using x (as the test below does).
    return pl.pallas_call(
        kernel,
        out_shape=jax.ShapeDtypeStruct((rows, cols), dtype),
        grid_spec=pltpu.PrefetchScalarGridSpec(
            num_scalar_prefetch=0,
            grid=(grid,),
            in_specs=[pl.BlockSpec((block_rows, cols), lambda i: (i, 0))],
            out_specs=pl.BlockSpec((block_rows, cols), lambda i: (i, 0)),
        ),
        compiler_params=pltpu.CompilerParams(
            dimension_semantics=("parallel",),
        ),
    )


class RangeBound:
    """JAX/Pallas equivalent of the PyTorch RangeBound module (forward only).

    Forward computes clip(x, min, max) inside a Pallas TPU kernel.
    """

    def __init__(self, min=None, max=None):
        # Mirror the PyTorch buffer: [min_or_nan, max_or_nan].  Kept only for
        # parity; the static _bound_min/_bound_max drive the kernel.
        self.bound = jnp.array(
            [float("nan") if min is None else float(min),
             float("nan") if max is None else float(max)],
            dtype=jnp.float32,
        )
        self._bound_min = None if min is None else float(min)
        self._bound_max = None if max is None else float(max)

    @property
    def bound_min(self):
        return self._bound_min

    @property
    def bound_max(self):
        return self._bound_max

    def _clip_2d(self, x2d):
        rows, cols = x2d.shape
        dt = jnp.dtype(x2d.dtype)
        sub = _sublane_multiple(dt)
        itemsize = dt.itemsize
        # ~2 MiB per block, rounded down to a sublane multiple; small inputs
        # collapse to the full row extent (legal: block dim == array dim).
        target_rows = max(sub, (_TARGET_BLOCK_BYTES // (cols * itemsize)) // sub * sub)
        block_rows = rows if rows <= target_rows else target_rows
        fn = _build_clip(rows, cols, block_rows, dt.name,
                         self._bound_min, self._bound_max)
        return fn(x2d)

    def __call__(self, x):
        orig_shape = x.shape
        n = x.size
        if n == 0:
            return x

        sub = _sublane_multiple(x.dtype)
        if n % _LANE == 0:
            # Common case (conv feature maps): free metadata reshape, no
            # padding, no trailing slice -> single HBM read + write.
            cols = _choose_cols(n, sub)
            rows = n // cols
            out2d = self._clip_2d(x.reshape(rows, cols))
            return out2d.reshape(orig_shape)

        # Ragged tail: pad only the last partial lane-row, slice it back off.
        rows = -(-n // _LANE)
        flat = jnp.pad(jnp.ravel(x), (0, rows * _LANE - n))
        out2d = self._clip_2d(flat.reshape(rows, _LANE))
        return out2d.reshape(-1)[:n].reshape(orig_shape)


def _reference(x, bound_min, bound_max):
    v = x
    if bound_min is not None:
        v = jnp.maximum(v, jnp.asarray(bound_min, v.dtype))
    if bound_max is not None:
        v = jnp.minimum(v, jnp.asarray(bound_max, v.dtype))
    return v


if __name__ == "__main__":
    key = jax.random.PRNGKey(0)
    # Small NCHW-style input consistent with a typical conv feature map
    # (size divisible by 128 -> fast path).
    x = jax.random.normal(key, (2, 4, 16, 16), dtype=jnp.float32) * 2.0
    # Ragged-size input (945 elements) to exercise the padded path.
    x_ragged = jax.random.normal(jax.random.PRNGKey(1), (3, 5, 7, 9),
                                 dtype=jnp.float32) * 2.0
    # bf16 input to exercise the sublane-multiple-of-16 path.
    x_bf16 = x.astype(jnp.bfloat16)

    # Exercise both bounds; also check one-sided / no-bound variants.
    cases = [
        (-0.5, 0.5),
        (None, 0.25),
        (-1.0, None),
        (None, None),
    ]
    ok = True
    for bmin, bmax in cases:
        mod = RangeBound(min=bmin, max=bmax)
        for inp in (x, x_ragged, x_bf16):
            out = jax.block_until_ready(mod(inp))
            ref = _reference(inp, bmin, bmax)
            if out.shape != inp.shape or out.dtype != inp.dtype:
                ok = False
            if not jnp.array_equal(out, ref):
                ok = False

    # TODO(synk): the custom backward (gradient gating outside the range) is
    # an autograd rule, not a forward op; it would be added via jax.custom_vjp.
    if ok:
        print("KERNEL_OK")
</pallas_src>

<mosaic_0001>
module attributes {stable_mosaic.version = 11 : i64} {
  func.func @_range_bound_kernel(%arg0: i32, %arg1: memref<8x256xf32, #tpu.memory_space<vmem>>, %arg2: memref<8x256xf32, #tpu.memory_space<vmem>>) attributes {dimension_semantics = [#tpu.dimension_semantics<parallel>], iteration_bounds = array<i64: 1>, scalar_prefetch = 0 : i64, scratch_operands = 0 : i64, tpu.core_type = #tpu.core_type<tc>, window_params = [{transform_indices = @transform_0, window_bounds = array<i64: 8, 256>}, {transform_indices = @transform_1, window_bounds = array<i64: 8, 256>}]} {
    %c0 = arith.constant 0 : index
    %c0_0 = arith.constant 0 : index
    %0 = vector.load %arg1[%c0, %c0_0] : memref<8x256xf32, #tpu.memory_space<vmem>>, vector<8x256xf32>
    %cst = arith.constant -5.000000e-01 : f32
    %1 = vector.broadcast %cst : f32 to vector<8x256xf32>
    %2 = arith.maximumf %0, %1 : vector<8x256xf32>
    %cst_1 = arith.constant 5.000000e-01 : f32
    %3 = vector.broadcast %cst_1 : f32 to vector<8x256xf32>
    %4 = arith.minimumf %2, %3 : vector<8x256xf32>
    %c0_2 = arith.constant 0 : index
    %c0_3 = arith.constant 0 : index
    %5 = vector.load %arg2[%c0_2, %c0_3] : memref<8x256xf32, #tpu.memory_space<vmem>>, vector<8x256xf32>
    tpu.vector_store %arg2[%c0_2, %c0_3], %4 {strides = array<i32>} : memref<8x256xf32, #tpu.memory_space<vmem>>, vector<8x256xf32>,
    return
  }
  func.func @transform_0(%arg0: i32) -> (i32, i32) {
    %c0_i32 = arith.constant 0 : i32
    %c0_i32_0 = arith.constant 0 : i32
    return %arg0, %c0_i32 : i32, i32
  }
  func.func @transform_1(%arg0: i32) -> (i32, i32) {
    %c0_i32 = arith.constant 0 : i32
    %c0_i32_0 = arith.constant 0 : i32
    return %arg0, %c0_i32 : i32, i32
  }
}

</mosaic_0001>

<bundles_post_ra>
// kernel: tpu_custom_call.1
= control target key start
LH: loop header
LB: loop body
LE: loop exit
PB: predicated region body
PF: predicated region fallthrough
CT: control target
= control target key end

     0   :  { %6 = vsyncpa [#allocation3], 0  ;;  %s132_s0 = inlined_call_operand.hbm [shape: f32[8,256], index: 0, kind: input, shape index: {}]   ;;  %s133_s1 = inlined_call_operand.hbm [shape: f32[8,256], index: 1, kind: output, shape index: {}]  }
   0x1   :  { %7 = vsyncpa [#allocation4], 0  ;;  %s96_s6 = smov [#allocation2]   ;;  %s48_s10 = scalar_lea.hbm %s132_s0, 256 }
   0x2   :  { %s14_s7 = sshll.u32 %s96_s6, 4  ;;  %p49_p0 = scmp.ne.s32.totalorder %s132_s0, %s48_s10  ;;  %s15_s7 = int_to_ptr.vmem [resolvable:$true] %s14_s7 }
   0x3   :  { %p52_p1 = scmp.lt.u32.totalorder %s48_s10, %s132_s0 }
   0x5   :  { %p54_p2 = pnand %p52_p1, %p49_p0 }
   0x7   :  { %57 = shalt.err (!%p54_p2)
}
   0x8   :  { %s58_s15 = scalar_lea.vmem %s15_s7, 256  ;;  %p63_p4 = scmp.lt.s32.totalorder %s15_s7, %s15_s7 }
   0x9   :  { %p59_p3 = scmp.ne.s32.totalorder %s15_s7, %s58_s15  ;;  %p64_p5 = scmp.lt.s32.totalorder %s58_s15, %s58_s15 }
   0xb   :  { %p65_p6 = por %p64_p5, %p63_p4 }
   0xd   :  { %p66_p7 = pnand %p65_p6, %p59_p3 }
   0xf   :  { %69 = shalt.err (!%p66_p7)
}
  0x10   :  { %17 = dma.hbm_to_vmem [thread:$0]  %s132_s0, 256, %s15_s7, [#allocation3]  }
  0x11   :  { %92 = dma.done.wait [#allocation3], 256  }
  0x12   :  { %93 = vsyncadd [#allocation3], 4294967040  ;;  %s97_s18 = smov [#allocation5]   ;;  %v21_v0 = vld [vmem:[#allocation2] sm:$0xff]  ;;  %v22_v1 = vld [vmem:[#allocation2 + $0x8] sm:$0xff] }
  0x13   :  { %s35_s19 = sshll.u32 %s97_s18, 4  ;;  %v44_v2 = vclamps-f32 %v21_v0, 0.5  ;;  %v45_v3 = vclamps-f32 %v22_v1, 0.5  ;;  %s36_s19 = int_to_ptr.vmem [resolvable:$true] %s35_s19 }
  0x14   :  { %s70_s20 = scalar_lea.vmem %s36_s19, 256  ;;  %p75_p9 = scmp.lt.s32.totalorder %s36_s19, %s36_s19 }
  0x15   :  { %27 = vst [vmem:[#allocation5] sm:$0xff] %v44_v2  ;;  %28 = vst [vmem:[#allocation5 + $0x8] sm:$0xff] %v45_v3  ;;  %p71_p8 = scmp.ne.s32.totalorder %s36_s19, %s70_s20  ;;  %p76_p10 = scmp.lt.s32.totalorder %s70_s20, %s70_s20 }
  0x17   :  { %p77_p11 = por %p76_p10, %p75_p9 }
  0x19   :  { %p78_p12 = pnand %p77_p11, %p71_p8 }
  0x1b   :  { %81 = shalt.err (!%p78_p12)
}
  0x1c   :  { %s82_s22 = scalar_lea.hbm %s133_s1, 256 }
  0x1d   :  { %p83_p13 = scmp.ne.s32.totalorder %s133_s1, %s82_s22  ;;  %p86_p0 = scmp.lt.u32.totalorder %s82_s22, %s133_s1 }
  0x1f   :  { %p88_p1 = pnand %p86_p0, %p83_p13 }
  0x21   :  { %91 = shalt.err (!%p88_p1)
}
  0x22   :  { %38 = dma.vmem_to_hbm [thread:$0]  %s36_s19, 256, %s133_s1, [#allocation4]  }
  0x23   :  { %94 = dma.done.wait [#allocation4], 256  }
  0x24   :  { %95 = vsyncadd [#allocation4], 4294967040 }
  0x25   :  { %42 = vsyncpa [#allocation3], 1 }
  0x26   :  { %43 = vsyncpa [#allocation4], 1 }

</bundles_post_ra>
